<compile_context>
chip_gen: v7x
topology: tpu7x:2x2x1
jax: 0.10.0
libtpu: 0.0.40
codegen_flags: <defaults>
</compile_context>

<pallas_src>
import jax
import jax.numpy as jnp
from jax.experimental import pallas as pl
from jax.experimental.pallas import tpu as pltpu

_LANE = 128
_SUBLANE = 8


def _round_up(n, m):
    return ((n + m - 1) // m) * m


def _cdiv(a, b):
    return (a + b - 1) // b


def _mlp_kernel(alphas_ref,            # SMEM (2,) f32 : PReLU alphas
                x_ref,                 # VMEM (TM, obs) f32   (streamed)
                w1_ref, b1_ref,        # VMEM (obs, Hp) bf16 / (1, Hp) f32 (resident)
                w2_ref, b2_ref,        # VMEM (Hp, Hp)  bf16 / (1, Hp) f32 (resident)
                w3_ref, b3_ref,        # VMEM (Hp, Op)  bf16 / (1, Op) f32 (resident)
                o_ref):                # VMEM (TM, Op) bf16
    a1 = alphas_ref[0]
    a2 = alphas_ref[1]

    # f32 -> bf16 cast done per-tile in-kernel (cheap VPU op, hidden under the
    # pipeline) instead of a separate un-hidden XLA pass in the wrapper.
    x = x_ref[...].astype(jnp.bfloat16)

    # Layer 1: Linear (bf16 MXU, f32 acc) + Dropout(identity) + PReLU (f32 VPU)
    h = jnp.dot(x, w1_ref[...], preferred_element_type=jnp.float32) + b1_ref[...]
    h = jnp.where(h > 0, h, a1 * h)

    # Layer 2: Linear + Dropout(identity) + PReLU
    h = jnp.dot(h.astype(jnp.bfloat16), w2_ref[...],
                preferred_element_type=jnp.float32) + b2_ref[...]
    h = jnp.where(h > 0, h, a2 * h)

    # Layer 3: Linear (lane-dense Op; padded cols stripped by the wrapper)
    o = jnp.dot(h.astype(jnp.bfloat16), w3_ref[...],
                preferred_element_type=jnp.float32) + b3_ref[...]
    o_ref[...] = o.astype(o_ref.dtype)   # bf16 writeback (halves HBM out stream)


def prepare_params(params):
    """One-time padding / bf16 casting of the static params (hoisted out of
    the per-call hot path). Padded lanes are zero, so they stay exactly zero
    through bias-add and PReLU and never leak into later layers."""
    H = params["w1"].shape[1]
    OUT = params["w3"].shape[1]
    Hp = _round_up(max(H, _LANE), _LANE)
    Op = _round_up(max(OUT, _LANE), _LANE)
    return {
        "w1": jnp.pad(params["w1"], ((0, 0), (0, Hp - H))).astype(jnp.bfloat16),
        "b1": jnp.pad(params["b1"], ((0, 0), (0, Hp - H))).astype(jnp.float32),
        "w2": jnp.pad(params["w2"], ((0, Hp - H), (0, Hp - H))).astype(jnp.bfloat16),
        "b2": jnp.pad(params["b2"], ((0, 0), (0, Hp - H))).astype(jnp.float32),
        "w3": jnp.pad(params["w3"], ((0, Hp - H), (0, Op - OUT))).astype(jnp.bfloat16),
        "b3": jnp.pad(params["b3"], ((0, 0), (0, Op - OUT))).astype(jnp.float32),
        "alphas": jnp.concatenate(
            [params["a1"].reshape(-1), params["a2"].reshape(-1)]).astype(jnp.float32),
        "out_dim": OUT,
        "hidden_pad": Hp,
        "out_pad": Op,
    }


def network_forward(x, prepped, *, block_rows=2048):
    """x: (B, obs_dim) float32. prepped: output of prepare_params()."""
    B, obs_dim = x.shape
    Hp = prepped["hidden_pad"]
    Op = prepped["out_pad"]
    OUT = prepped["out_dim"]

    # Batch tiling: pad B only to a multiple of 8, then pick n_tiles so the
    # tile size divides exactly (waste <= 8 rows/tile, never ~tm rows), with
    # at least 2 tiles for mid/large batches so v7x's 2nd TC isn't idle.
    B8 = _round_up(B, _SUBLANE)
    n_tiles = max(_cdiv(B8, block_rows), 1)
    if n_tiles < 2 and B8 >= 2 * _SUBLANE:
        n_tiles = 2
    tm = _round_up(_cdiv(B8, n_tiles), _SUBLANE)
    B_pad = n_tiles * tm

    x_pad = jnp.pad(x, ((0, B_pad - B), (0, 0)))   # f32 pad only; cast in-kernel

    flops = 2 * B_pad * (obs_dim * Hp + Hp * Hp + Hp * Op)
    bytes_accessed = (x_pad.size * 4
                      + (prepped["w1"].size + prepped["w2"].size + prepped["w3"].size) * 2
                      + (prepped["b1"].size + prepped["b2"].size + prepped["b3"].size) * 4
                      + B_pad * Op * 2)

    out_padded = pl.pallas_call(
        _mlp_kernel,
        out_shape=jax.ShapeDtypeStruct((B_pad, Op), jnp.bfloat16),
        grid=(n_tiles,),
        in_specs=[
            # PReLU alphas: scalars in SMEM (no VMEM DMA / lane extract).
            pl.BlockSpec(memory_space=pltpu.MemorySpace.SMEM),
            # Streamed activations (f32; cast to bf16 inside the kernel).
            pl.BlockSpec((tm, obs_dim), lambda i: (i, 0)),
            # VMEM-resident weights / biases (block index constant across grid).
            pl.BlockSpec((obs_dim, Hp), lambda i: (0, 0)),
            pl.BlockSpec((1, Hp),       lambda i: (0, 0)),
            pl.BlockSpec((Hp, Hp),      lambda i: (0, 0)),
            pl.BlockSpec((1, Hp),       lambda i: (0, 0)),
            pl.BlockSpec((Hp, Op),      lambda i: (0, 0)),
            pl.BlockSpec((1, Op),       lambda i: (0, 0)),
        ],
        out_specs=pl.BlockSpec((tm, Op), lambda i: (i, 0)),
        compiler_params=pltpu.CompilerParams(
            dimension_semantics=("parallel",)),   # batch axis -> both TCs on v7x
        cost_estimate=pl.CostEstimate(
            flops=flops, transcendentals=0, bytes_accessed=bytes_accessed),
    )(prepped["alphas"], x_pad,
      prepped["w1"], prepped["b1"],
      prepped["w2"], prepped["b2"],
      prepped["w3"], prepped["b3"])

    # Tiny (B, OUT) window; cast back to f32 to preserve the module interface.
    # (A consumer that tolerates bf16 / padded output could read out_padded
    #  directly and skip this slice entirely.)
    return out_padded[:B, :OUT].astype(jnp.float32)


def init_params(key, obs_dim, hidden_dim, output_dim):
    """Deterministic init mirroring nn.Linear default (U(-1/sqrt(in), 1/sqrt(in)))."""
    ks = jax.random.split(key, 6)

    def linear(kw, kb, fan_in, fan_out):
        bound = 1.0 / jnp.sqrt(jnp.float32(fan_in))
        w = jax.random.uniform(kw, (fan_in, fan_out), jnp.float32, -bound, bound)
        b = jax.random.uniform(kb, (1, fan_out), jnp.float32, -bound, bound)
        return w, b

    w1, b1 = linear(ks[0], ks[1], obs_dim, hidden_dim)
    w2, b2 = linear(ks[2], ks[3], hidden_dim, hidden_dim)
    w3, b3 = linear(ks[4], ks[5], hidden_dim, output_dim)
    # PReLU default init: alpha = 0.25 (single shared parameter)
    a1 = jnp.full((1, 1), 0.25, jnp.float32)
    a2 = jnp.full((1, 1), 0.25, jnp.float32)
    return {"w1": w1, "b1": b1, "a1": a1,
            "w2": w2, "b2": b2, "a2": a2,
            "w3": w3, "b3": b3}


def reference_forward(x, p):
    """Pure-JAX reference mirroring kernel numerics (bf16 MXU operands, f32 acc,
    f32 bias/PReLU, bf16 output)."""
    def dot_bf16(a, b):
        return jnp.dot(a.astype(jnp.bfloat16), b.astype(jnp.bfloat16),
                       preferred_element_type=jnp.float32)

    def prelu(h, a):
        return jnp.where(h > 0, h, a * h)

    h = prelu(dot_bf16(x, p["w1"]) + p["b1"], p["a1"][0, 0])
    h = prelu(dot_bf16(h, p["w2"]) + p["b2"], p["a2"][0, 0])
    o = dot_bf16(h, p["w3"]) + p["b3"]
    return o.astype(jnp.bfloat16).astype(jnp.float32)


if __name__ == "__main__":
    OBS, HID, OUT = 32, 32, 8

    key = jax.random.PRNGKey(0)
    k_x, k_x2, k_p = jax.random.split(key, 3)
    params = init_params(k_p, OBS, HID, OUT)
    prepped = prepare_params(params)          # one-time param prep (hoisted)

    # Small batch (single tile).
    x = jax.random.normal(k_x, (8, OBS), jnp.float32)
    out = jax.block_until_ready(network_forward(x, prepped))
    ref = reference_forward(x, params)
    assert out.shape == (8, OUT), out.shape
    assert jnp.allclose(out, ref, atol=2e-2, rtol=2e-2), "mismatch vs reference (B=8)"

    # Ragged batch (exercises batch padding + 2-tile grid path).
    x2 = jax.random.normal(k_x2, (20, OBS), jnp.float32)
    out2 = jax.block_until_ready(network_forward(x2, prepped))
    ref2 = reference_forward(x2, params)
    assert out2.shape == (20, OUT), out2.shape
    assert jnp.allclose(out2, ref2, atol=2e-2, rtol=2e-2), "mismatch vs reference (B=20)"

    print("KERNEL_OK")
</pallas_src>

<mosaic_0001>
module attributes {stable_mosaic.version = 11 : i64} {
  func.func @_mlp_kernel(%arg0: i32, %arg1: memref<2xf32, #tpu.memory_space<smem>>, %arg2: memref<8x32xf32, #tpu.memory_space<vmem>>, %arg3: memref<32x128xbf16, #tpu.memory_space<vmem>>, %arg4: memref<1x128xf32, #tpu.memory_space<vmem>>, %arg5: memref<128x128xbf16, #tpu.memory_space<vmem>>, %arg6: memref<1x128xf32, #tpu.memory_space<vmem>>, %arg7: memref<128x128xbf16, #tpu.memory_space<vmem>>, %arg8: memref<1x128xf32, #tpu.memory_space<vmem>>, %arg9: memref<8x128xbf16, #tpu.memory_space<vmem>>) attributes {dimension_semantics = [#tpu.dimension_semantics<parallel>], iteration_bounds = array<i64: 1>, scalar_prefetch = 0 : i64, scratch_operands = 0 : i64, tpu.core_type = #tpu.core_type<tc>, window_params = [{transform_indices = @transform_0, window_bounds = array<i64: 2>}, {transform_indices = @transform_1, window_bounds = array<i64: 8, 32>}, {pipeline_mode = #tpu.pipeline_mode<synchronous>, transform_indices = @transform_2, window_bounds = array<i64: 32, 128>}, {pipeline_mode = #tpu.pipeline_mode<synchronous>, transform_indices = @transform_3, window_bounds = array<i64: 1, 128>}, {pipeline_mode = #tpu.pipeline_mode<synchronous>, transform_indices = @transform_4, window_bounds = array<i64: 128, 128>}, {pipeline_mode = #tpu.pipeline_mode<synchronous>, transform_indices = @transform_5, window_bounds = array<i64: 1, 128>}, {pipeline_mode = #tpu.pipeline_mode<synchronous>, transform_indices = @transform_6, window_bounds = array<i64: 128, 128>}, {pipeline_mode = #tpu.pipeline_mode<synchronous>, transform_indices = @transform_7, window_bounds = array<i64: 1, 128>}, {transform_indices = @transform_8, window_bounds = array<i64: 8, 128>}]} {
    %c0 = arith.constant 0 : index
    %0 = memref.load %arg1[%c0] : memref<2xf32, #tpu.memory_space<smem>>
    %c1 = arith.constant 1 : index
    %1 = memref.load %arg1[%c1] : memref<2xf32, #tpu.memory_space<smem>>
    %c0_0 = arith.constant 0 : index
    %c0_1 = arith.constant 0 : index
    %2 = vector.load %arg2[%c0_0, %c0_1] : memref<8x32xf32, #tpu.memory_space<vmem>>, vector<8x32xf32>
    %3 = arith.truncf %2 : vector<8x32xf32> to vector<8x32xbf16>
    %c0_2 = arith.constant 0 : index
    %c0_3 = arith.constant 0 : index
    %4 = vector.load %arg3[%c0_2, %c0_3] : memref<32x128xbf16, #tpu.memory_space<vmem>>, vector<32x128xbf16>
    %cst = arith.constant dense<0.000000e+00> : vector<8x128xf32>
    %5 = tpu.matmul %3, %4, %cst {dimension_numbers = #tpu.dot_dimension_numbers<[1], [0], [0], [1], [0, 0, 1, 1], [], []>} : vector<8x32xbf16>, vector<32x128xbf16>, vector<8x128xf32> -> vector<8x128xf32>
    %c0_4 = arith.constant 0 : index
    %c0_5 = arith.constant 0 : index
    %6 = vector.load %arg4[%c0_4, %c0_5] : memref<1x128xf32, #tpu.memory_space<vmem>>, vector<1x128xf32>
    %7 = vector.broadcast %6 : vector<1x128xf32> to vector<8x128xf32>
    %8 = arith.addf %5, %7 : vector<8x128xf32>
    %cst_6 = arith.constant 0.000000e+00 : f32
    %9 = vector.broadcast %cst_6 : f32 to vector<8x128xf32>
    %10 = arith.cmpf ogt, %8, %9 : vector<8x128xf32>
    %11 = vector.broadcast %0 : f32 to vector<8x128xf32>
    %12 = arith.mulf %11, %8 : vector<8x128xf32>
    %13 = arith.select %10, %8, %12 : vector<8x128xi1>, vector<8x128xf32>
    %14 = arith.truncf %13 : vector<8x128xf32> to vector<8x128xbf16>
    %c0_7 = arith.constant 0 : index
    %c0_8 = arith.constant 0 : index
    %15 = vector.load %arg5[%c0_7, %c0_8] : memref<128x128xbf16, #tpu.memory_space<vmem>>, vector<128x128xbf16>
    %cst_9 = arith.constant dense<0.000000e+00> : vector<8x128xf32>
    %16 = tpu.matmul %14, %15, %cst_9 {dimension_numbers = #tpu.dot_dimension_numbers<[1], [0], [0], [1], [0, 0, 1, 1], [], []>} : vector<8x128xbf16>, vector<128x128xbf16>, vector<8x128xf32> -> vector<8x128xf32>
    %c0_10 = arith.constant 0 : index
    %c0_11 = arith.constant 0 : index
    %17 = vector.load %arg6[%c0_10, %c0_11] : memref<1x128xf32, #tpu.memory_space<vmem>>, vector<1x128xf32>
    %18 = vector.broadcast %17 : vector<1x128xf32> to vector<8x128xf32>
    %19 = arith.addf %16, %18 : vector<8x128xf32>
    %cst_12 = arith.constant 0.000000e+00 : f32
    %20 = vector.broadcast %cst_12 : f32 to vector<8x128xf32>
    %21 = arith.cmpf ogt, %19, %20 : vector<8x128xf32>
    %22 = vector.broadcast %1 : f32 to vector<8x128xf32>
    %23 = arith.mulf %22, %19 : vector<8x128xf32>
    %24 = arith.select %21, %19, %23 : vector<8x128xi1>, vector<8x128xf32>
    %25 = arith.truncf %24 : vector<8x128xf32> to vector<8x128xbf16>
    %c0_13 = arith.constant 0 : index
    %c0_14 = arith.constant 0 : index
    %26 = vector.load %arg7[%c0_13, %c0_14] : memref<128x128xbf16, #tpu.memory_space<vmem>>, vector<128x128xbf16>
    %cst_15 = arith.constant dense<0.000000e+00> : vector<8x128xf32>
    %27 = tpu.matmul %25, %26, %cst_15 {dimension_numbers = #tpu.dot_dimension_numbers<[1], [0], [0], [1], [0, 0, 1, 1], [], []>} : vector<8x128xbf16>, vector<128x128xbf16>, vector<8x128xf32> -> vector<8x128xf32>
    %c0_16 = arith.constant 0 : index
    %c0_17 = arith.constant 0 : index
    %28 = vector.load %arg8[%c0_16, %c0_17] : memref<1x128xf32, #tpu.memory_space<vmem>>, vector<1x128xf32>
    %29 = vector.broadcast %28 : vector<1x128xf32> to vector<8x128xf32>
    %30 = arith.addf %27, %29 : vector<8x128xf32>
    %31 = arith.truncf %30 : vector<8x128xf32> to vector<8x128xbf16>
    %c0_18 = arith.constant 0 : index
    %c0_19 = arith.constant 0 : index
    %32 = vector.load %arg9[%c0_18, %c0_19] : memref<8x128xbf16, #tpu.memory_space<vmem>>, vector<8x128xbf16>
    tpu.vector_store %arg9[%c0_18, %c0_19], %31 {strides = array<i32>} : memref<8x128xbf16, #tpu.memory_space<vmem>>, vector<8x128xbf16>,
    return
  }
  func.func @transform_0(%arg0: i32) -> i32 {
    %c0_i32 = arith.constant 0 : i32
    %c0_i32_0 = arith.constant 0 : i32
    return %c0_i32 : i32
  }
  func.func @transform_1(%arg0: i32) -> (i32, i32) {
    %c0_i32 = arith.constant 0 : i32
    %c0_i32_0 = arith.constant 0 : i32
    return %arg0, %c0_i32 : i32, i32
  }
  func.func @transform_2(%arg0: i32) -> (i32, i32) {
    %c0_i32 = arith.constant 0 : i32
    %c0_i32_0 = arith.constant 0 : i32
    %c0_i32_1 = arith.constant 0 : i32
    return %c0_i32, %c0_i32_0 : i32, i32
  }
  func.func @transform_3(%arg0: i32) -> (i32, i32) {
    %c0_i32 = arith.constant 0 : i32
    %c0_i32_0 = arith.constant 0 : i32
    %c0_i32_1 = arith.constant 0 : i32
    return %c0_i32, %c0_i32_0 : i32, i32
  }
  func.func @transform_4(%arg0: i32) -> (i32, i32) {
    %c0_i32 = arith.constant 0 : i32
    %c0_i32_0 = arith.constant 0 : i32
    %c0_i32_1 = arith.constant 0 : i32
    return %c0_i32, %c0_i32_0 : i32, i32
  }
  func.func @transform_5(%arg0: i32) -> (i32, i32) {
    %c0_i32 = arith.constant 0 : i32
    %c0_i32_0 = arith.constant 0 : i32
    %c0_i32_1 = arith.constant 0 : i32
    return %c0_i32, %c0_i32_0 : i32, i32
  }
  func.func @transform_6(%arg0: i32) -> (i32, i32) {
    %c0_i32 = arith.constant 0 : i32
    %c0_i32_0 = arith.constant 0 : i32
    %c0_i32_1 = arith.constant 0 : i32
    return %c0_i32, %c0_i32_0 : i32, i32
  }
  func.func @transform_7(%arg0: i32) -> (i32, i32) {
    %c0_i32 = arith.constant 0 : i32
    %c0_i32_0 = arith.constant 0 : i32
    %c0_i32_1 = arith.constant 0 : i32
    return %c0_i32, %c0_i32_0 : i32, i32
  }
  func.func @transform_8(%arg0: i32) -> (i32, i32) {
    %c0_i32 = arith.constant 0 : i32
    %c0_i32_0 = arith.constant 0 : i32
    return %arg0, %c0_i32 : i32, i32
  }
}

</mosaic_0001>

<bundles_post_ra>
// kernel: tpu_custom_call.1
= control target key start
LH: loop header
LB: loop body
LE: loop exit
PB: predicated region body
PF: predicated region fallthrough
CT: control target
= control target key end

     0   :  { %13 = vsyncpa [#allocation5], 0  ;;  %s844_s0 = inlined_call_operand.hbm [shape: f32[2], index: 0, kind: input, shape index: {}]   ;;  %s845_s1 = inlined_call_operand.hbm [shape: f32[8,32], index: 1, kind: input, shape index: {}]   ;;  %s846_s2 = inlined_call_operand.hbm [shape: bf16[32,128], index: 2, kind: input, shape index: {}]   ;;  %s847_s3 = inlined_call_operand.vmem [shape: f32[1,128], index: 3, kind: input, shape index: {}]   ;;  %s848_s4 = inlined_call_operand.hbm [shape: bf16[128,128], index: 4, kind: input, shape index: {}]   ;;  %s849_s5 = inlined_call_operand.vmem [shape: f32[1,128], index: 5, kind: input, shape index: {}]   ;;  %s850_s6 = inlined_call_operand.hbm [shape: bf16[128,128], index: 6, kind: input, shape index: {}]   ;;  %s851_s7 = inlined_call_operand.vmem [shape: f32[1,128], index: 7, kind: input, shape index: {}]   ;;  %s852_s8 = inlined_call_operand.hbm [shape: bf16[8,128], index: 8, kind: output, shape index: {}]  }
   0x1   :  { %14 = vsyncpa [#allocation3], 0 }
   0x2   :  { %15 = vsyncpa [#allocation8], 0 }
   0x3   :  { %16 = vsyncpa [#allocation11], 0 }
   0x4   :  { %17 = vsyncpa [#allocation4], 0  ;;  %s668_s27 = smov [#allocation7]   ;;  %s538_s9 = scalar_lea.hbm %s846_s2, 256 }
   0x5   :  { %s41_s28 = sshll.u32 %s668_s27, 4  ;;  %p539_p0 = scmp.ne.s32.totalorder %s846_s2, %s538_s9  ;;  %s42_s28 = int_to_ptr.vmem [resolvable:$true] %s41_s28 }
   0x6   :  { %p542_p1 = scmp.lt.u32.totalorder %s538_s9, %s846_s2 }
   0x8   :  { %p544_p2 = pnand %p542_p1, %p539_p0 }
   0xa   :  { %547 = shalt.err (!%p544_p2)
}
   0xb   :  { %s548_s14 = scalar_lea.vmem %s42_s28, 256  ;;  %p553_p4 = scmp.lt.s32.totalorder %s42_s28, %s42_s28 }
   0xc   :  { %p549_p3 = scmp.ne.s32.totalorder %s42_s28, %s548_s14  ;;  %p554_p5 = scmp.lt.s32.totalorder %s548_s14, %s548_s14 }
   0xe   :  { %p555_p6 = por %p554_p5, %p553_p4 }
  0x10   :  { %p556_p7 = pnand %p555_p6, %p549_p3 }
  0x12   :  { %559 = shalt.err (!%p556_p7)
}
  0x13   :  { %s669_s15 = smov 64   ;;  %s670_s16 = smov 4  }
  0x14   :  { %47 = dma.hbm_to_vmem [thread:$0]  %s846_s2, 256, %s42_s28, [#allocation8], %s669_s15, %s669_s15, %s670_s16  }
  0x15   :  { %s560_s21 = scalar_lea.hbm %s844_s0, 16 }
  0x16   :  { %p561_p8 = scmp.ne.s32.totalorder %s844_s0, %s560_s21  ;;  %p564_p9 = scmp.lt.u32.totalorder %s560_s21, %s844_s0 }
  0x18   :  { %p566_p10 = pnand %p564_p9, %p561_p8 }
  0x1a   :  { %569 = shalt.err (!%p566_p10)
}
  0x1b   :  { %s671_s26 = smov [#allocation2]   ;;  %s672_s2 = smov [#allocation6]  }
  0x1c   :  { %25 = dma.hbm_to_smem %s844_s0, 16, %s671_s26, [#allocation5]  }
  0x1d   :  { %s32_s28 = sshll.u32 %s672_s2, 4  ;;  %s673_s30 = smov [#allocation9]   ;;  %s33_s28 = int_to_ptr.vmem [resolvable:$true] %s32_s28 }
  0x1e   :  { %s55_s9 = sshll.u32 %s673_s30, 4  ;;  %s570_s12 = scalar_lea.hbm %s845_s1, 128  ;;  %s750_s9 = int_to_ptr.vmem [resolvable:$true] %s55_s9 }
  0x1f   :  { %p571_p11 = scmp.ne.s32.totalorder %s845_s1, %s570_s12  ;;  %p574_p12 = scmp.lt.u32.totalorder %s570_s12, %s845_s1 }
  0x21   :  { %p576_p13 = pnand %p574_p12, %p571_p11 }
  0x23   :  { %579 = shalt.err (!%p576_p13)
}
  0x24   :  { %s580_s0 = scalar_lea.vmem %s33_s28, 128  ;;  %p585_p1 = scmp.lt.s32.totalorder %s33_s28, %s33_s28 }
  0x25   :  { %p581_p0 = scmp.ne.s32.totalorder %s33_s28, %s580_s0  ;;  %p586_p2 = scmp.lt.s32.totalorder %s580_s0, %s580_s0 }
  0x27   :  { %p587_p3 = por %p586_p2, %p585_p1 }
  0x29   :  { %p588_p4 = pnand %p587_p3, %p581_p0 }
  0x2b   :  { %591 = shalt.err (!%p588_p4)
}
  0x2c   :  { %35 = dma.hbm_to_vmem [thread:$0]  %s845_s1, 128, %s33_s28, [#allocation3]  }
  0x2d   :  { %s592_s23 = scalar_lea.hbm %s848_s4, 1024 }
  0x2e   :  { %p593_p5 = scmp.ne.s32.totalorder %s848_s4, %s592_s23  ;;  %p596_p6 = scmp.lt.u32.totalorder %s592_s23, %s848_s4 }
  0x30   :  { %p598_p7 = pnand %p596_p6, %p593_p5 }
  0x32   :  { %601 = shalt.err (!%p598_p7)
}
  0x33   :  { %s602_s29 = scalar_lea.vmem %s750_s9, 1024  ;;  %p607_p9 = scmp.lt.s32.totalorder %s750_s9, %s750_s9 }
  0x34   :  { %p603_p8 = scmp.ne.s32.totalorder %s750_s9, %s602_s29  ;;  %p608_p10 = scmp.lt.s32.totalorder %s602_s29, %s602_s29 }
  0x36   :  { %p609_p11 = por %p608_p10, %p607_p9 }
  0x38   :  { %p610_p12 = pnand %p609_p11, %p603_p8 }
  0x3a   :  { %613 = shalt.err (!%p610_p12)
}
  0x3b   :  { %61 = dma.hbm_to_vmem [thread:$0]  %s848_s4, 1024, %s750_s9, [#allocation8], %s669_s15, %s669_s15, %s670_s16  }
  0x3c   :  { %s674_s28 = smov [#allocation10]   ;;  %s614_s12 = scalar_lea.hbm %s850_s6, 1024 }
  0x3d   :  { %s69_s30 = sshll.u32 %s674_s28, 4  ;;  %p615_p13 = scmp.ne.s32.totalorder %s850_s6, %s614_s12  ;;  %s70_s30 = int_to_ptr.vmem [resolvable:$true] %s69_s30 }
  0x3e   :  { %p618_p0 = scmp.lt.u32.totalorder %s614_s12, %s850_s6 }
  0x40   :  { %p620_p1 = pnand %p618_p0, %p615_p13 }
  0x42   :  { %623 = shalt.err (!%p620_p1)
}
  0x43   :  { %s624_s0 = scalar_lea.vmem %s70_s30, 1024  ;;  %p629_p3 = scmp.lt.s32.totalorder %s70_s30, %s70_s30 }
  0x44   :  { %p625_p2 = scmp.ne.s32.totalorder %s70_s30, %s624_s0  ;;  %p630_p4 = scmp.lt.s32.totalorder %s624_s0, %s624_s0 }
  0x46   :  { %p631_p5 = por %p630_p4, %p629_p3 }
  0x48   :  { %p632_p6 = pnand %p631_p5, %p625_p2 }
  0x4a   :  { %635 = shalt.err (!%p632_p6)
}
  0x4b   :  { %75 = dma.hbm_to_vmem [thread:$0]  %s850_s6, 1024, %s70_s30, [#allocation11], %s669_s15, %s669_s15, %s670_s16  }
  0x4c   :  { %658 = dma.done.wait [#allocation5], 16  }
  0x4d   :  { %659 = vsyncadd [#allocation5], 4294967280 }
  0x4e   :  { %660 = dma.done.wait [#allocation3], 128  }
  0x4f   :  { %661 = vsyncadd [#allocation3], 4294967168 }
  0x50   :  { %662 = dma.done.wait [#allocation8], 1280  }
  0x51   :  { %663 = vsyncadd [#allocation8], 4294966016 }
  0x52   :  { %664 = dma.done.wait [#allocation11], 1024  }
  0x53   :  { %665 = vsyncadd [#allocation11], 4294966272 }
  0x54   :  { %93 = sfence }
  0x55   :  { %v520_v0 = vld [vmem:[#allocation7] sm:$0xff]   ;;  %v675_v1 = vmov 0.0   ;;  %v521_v2 = vld [vmem:[#allocation7 + $0x8] sm:$0xff]   ;;  %vm676_vm0 = vmmov 0   ;;  %v97_v3 = vld [vmem:[#allocation6] sm:$0xff]  ;;  %vm122_vm1 = vcmask 261120  }
  0x56   :  { %462 = vmatprep.subr.bf16.mxu0 %v675_v1  ;;  %470 = vmatprep.subr.bf16.mxu1 %v675_v1  ;;  %v522_v4 = vld [vmem:[#allocation9] sm:$0xff]   ;;  %v98_v5 = vpack.c.bf16 %v97_v3, %v97_v3  ;;  %v523_v6 = vld [vmem:[#allocation9 + $0x8] sm:$0xff]   ;;  %v524_v7 = vld [vmem:[#allocation9 + $0x10] sm:$0xff]   ;;  %s95_s6 = sld [smem:[#allocation2]]  ;;  %s418_s19 = sld [smem:[#allocation2 + $0x1]] }
  0x57   :  { %463 = vmatpush3.bf16.msra.mxu0 %v520_v0  ;;  %466 = vmatprep.mubr.msk.bf16.mxu0 %vm676_vm0, %v675_v1  ;;  %v525_v8 = vld [vmem:[#allocation9 + $0x18] sm:$0xff]   ;;  %v526_v9 = vld [vmem:[#allocation9 + $0x20] sm:$0xff]   ;;  %v527_v10 = vld [vmem:[#allocation9 + $0x28] sm:$0xff]   ;;  %s677_s23 = smov [#allocation12]  }
  0x58   :  { %464 = vmatprep.subr.bf16.mxu0 %v675_v1  ;;  %486 = vmatprep.mubr.msk.bf16.mxu1 %vm676_vm0, %v675_v1  ;;  %v528_v11 = vld [vmem:[#allocation9 + $0x30] sm:$0xff]   ;;  %v529_v12 = vld [vmem:[#allocation9 + $0x38] sm:$0xff]   ;;  %v530_v13 = vld [vmem:[#allocation10] sm:$0xff]   ;;  %s406_s24 = sshll.u32 %s677_s23, 4  ;;  %s407_s24 = int_to_ptr.vmem [resolvable:$true] %s406_s24 }
  0x59   :  { %471 = vmatpush3.bf16.msra.mxu1 %v522_v4  ;;  %v531_v14 = vld [vmem:[#allocation10 + $0x8] sm:$0xff]   ;;  %v532_v15 = vld [vmem:[#allocation10 + $0x10] sm:$0xff]   ;;  %v533_v16 = vld [vmem:[#allocation10 + $0x18] sm:$0xff]   ;;  %p641_p8 = scmp.lt.s32.totalorder %s407_s24, %s407_s24 }
  0x5a   :  { %472 = vmatprep.subr.bf16.mxu1 %v675_v1  ;;  %v534_v17 = vld [vmem:[#allocation10 + $0x20] sm:$0xff]   ;;  %v535_v18 = vld [vmem:[#allocation10 + $0x28] sm:$0xff]   ;;  %v536_v29 = vld [vmem:[#allocation10 + $0x30] sm:$0xff]  }
  0x5b   :  { %465 = vmatpush3.bf16.msra.mxu0 %v521_v2  ;;  %v419_v19 = vld [vmem:[%s847_s3] ss:$0 sm:$0xff]  ;;  %v537_v30 = vld [vmem:[#allocation10 + $0x38] sm:$0xff]  }
  0x5c   :  { %490 = vmatprep.subr.bf16.mxu0 %v675_v1  ;;  %v167_v21 = vstv %s95_s6  ;;  %v423_v31 = vld [vmem:[%s849_s5] ss:$0 sm:$0xff]  ;;  %v283_v33 = vstv %s418_s19  ;;  %s636_s5 = scalar_lea.vmem %s407_s24, 64 }
  0x5d   :  { %473 = vmatpush3.bf16.msra.mxu1 %v523_v6  ;;  %v432_v41 = vld [vmem:[%s851_s7] ss:$0 sm:$0xff]  ;;  %p637_p7 = scmp.ne.s32.totalorder %s407_s24, %s636_s5  ;;  %p642_p9 = scmp.lt.s32.totalorder %s636_s5, %s636_s5 }
  0x5e   :  { %467 = vmatmul.mubr.msk.bf16.vlgmr.msra.gmra.mrb[0].mxu0 %vm122_vm1, %v98_v5  ;;  %474 = vmatprep.subr.bf16.mxu1 %v675_v1 }
  0x5f   :  { %506 = vmatprep.mubr.msk.bf16.mxu0 %vm676_vm0, %v675_v1  ;;  %491 = vmatpush3.bf16.msra.mxu0 %v530_v13  ;;  %p643_p10 = por %p642_p9, %p641_p8 }
  0x60   :  { %492 = vmatprep.subr.bf16.mxu0 %v675_v1 }
  0x61   :  { %475 = vmatpush3.bf16.msra.mxu1 %v524_v7  ;;  %p644_p11 = pnand %p643_p10, %p637_p7 }
  0x62   :  { %476 = vmatprep.subr.bf16.mxu1 %v675_v1 }
  0x63   :  { %493 = vmatpush3.bf16.msra.mxu0 %v531_v14 }
  0x64   :  { %494 = vmatprep.subr.bf16.mxu0 %v675_v1 }
  0x65   :  { %477 = vmatpush3.bf16.msra.mxu1 %v525_v8 }
  0x66   :  { %478 = vmatprep.subr.bf16.mxu1 %v675_v1 }
  0x67   :  { %495 = vmatpush3.bf16.msra.mxu0 %v532_v15 }
  0x68   :  { %496 = vmatprep.subr.bf16.mxu0 %v675_v1 }
  0x69   :  { %479 = vmatpush3.bf16.msra.mxu1 %v526_v9 }
  0x6a   :  { %480 = vmatprep.subr.bf16.mxu1 %v675_v1 }
  0x6b   :  { %497 = vmatpush3.bf16.msra.mxu0 %v533_v16 }
  0x6c   :  { %498 = vmatprep.subr.bf16.mxu0 %v675_v1 }
  0x6d   :  { %481 = vmatpush3.bf16.msra.mxu1 %v527_v10 }
  0x6e   :  { %482 = vmatprep.subr.bf16.mxu1 %v675_v1 }
  0x6f   :  { %499 = vmatpush3.bf16.msra.mxu0 %v534_v17 }
  0x70   :  { %500 = vmatprep.subr.bf16.mxu0 %v675_v1 }
  0x71   :  { %483 = vmatpush3.bf16.msra.mxu1 %v528_v11 }
  0x72   :  { %484 = vmatprep.subr.bf16.mxu1 %v675_v1 }
  0x73   :  { %501 = vmatpush3.bf16.msra.mxu0 %v535_v18 }
  0x74   :  { %502 = vmatprep.subr.bf16.mxu0 %v675_v1 }
  0x75   :  { %485 = vmatpush3.bf16.msra.mxu1 %v529_v12 }
  0x77   :  { %503 = vmatpush3.bf16.msra.mxu0 %v536_v29 }
  0x78   :  { %504 = vmatprep.subr.bf16.mxu0 %v675_v1 }
  0x7b   :  { %505 = vmatpush3.bf16.msra.mxu0 %v537_v30 }
 0x131   :  { %v160_v20 = vpop.f32.mrb[0].mxu0 }
 0x132   :  { %v161_v22 = vadd.f32 %v419_v19, %v160_v20  ;;  %v468_v23 = vpop.f32.mrb[1].mxu0 }
 0x133   :  { %v163_v24 = vpop.f32.mrb[2].mxu0 }
 0x134   :  { %vm166_vm2 = vcmp.gt.f32.partialorder %v161_v22, 0.0  ;;  %v168_v25 = vmul.f32 %v167_v21, %v161_v22  ;;  %v469_v26 = vpop.f32.mrb[3].mxu0 }
 0x136   :  { %v169_v27 = vsel %vm166_vm2, %v161_v22, %v168_v25 }
 0x137   :  { %v170_v28 = vpack.c.bf16 %v169_v27, %v169_v27 }
 0x139   :  { %487 = vmatmul.mubr.bf16.vlgmr.msra.gmra.mrb[0].mxu1 %v170_v28 }
 0x20c   :  { %v276_v32 = vpop.f32.mrb[0].mxu1 }
 0x20d   :  { %v277_v34 = vadd.f32 %v423_v31, %v276_v32  ;;  %v488_v35 = vpop.f32.mrb[1].mxu1 }
 0x20e   :  { %v279_v36 = vpop.f32.mrb[2].mxu1 }
 0x20f   :  { %vm282_vm3 = vcmp.gt.f32.partialorder %v277_v34, 0.0  ;;  %v284_v37 = vmul.f32 %v283_v33, %v277_v34  ;;  %v489_v38 = vpop.f32.mrb[3].mxu1 }
 0x211   :  { %v285_v39 = vsel %vm282_vm3, %v277_v34, %v284_v37 }
 0x212   :  { %v286_v40 = vpack.c.bf16 %v285_v39, %v285_v39 }
 0x214   :  { %507 = vmatmul.mubr.bf16.vlgmr.msra.gmra.mrb[4].mxu0 %v286_v40 }
 0x2e7   :  { %v392_v42 = vpop.f32.mrb[4].mxu0 }
 0x2e8   :  { %v393_v43 = vadd.f32 %v432_v41, %v392_v42  ;;  %v508_v44 = vpop.f32.mrb[5].mxu0 }
 0x2e9   :  { %v395_v45 = vpop.f32.mrb[6].mxu0 }
 0x2ea   :  { %v509_v46 = vpop.f32.mrb[7].mxu0  ;;  %v398_v47 = vpack.c.bf16 %v393_v43, %v393_v43 }
 0x2ec   :  { %399 = vst [vmem:[#allocation12] sm:$0xf] %v398_v47 }
 0x2ed   :  { %647 = shalt.err (!%p644_p11)
}
 0x2ee   :  { %s648_s7 = scalar_lea.hbm %s852_s8, 64 }
 0x2ef   :  { %p649_p12 = scmp.ne.s32.totalorder %s852_s8, %s648_s7  ;;  %p652_p13 = scmp.lt.u32.totalorder %s648_s7, %s852_s8 }
 0x2f1   :  { %p654_p0 = pnand %p652_p13, %p649_p12 }
 0x2f3   :  { %657 = shalt.err (!%p654_p0)
}
 0x2f4   :  { %409 = dma.vmem_to_hbm [thread:$0]  %s407_s24, 64, %s852_s8, [#allocation4]  }
 0x2f5   :  { %666 = dma.done.wait [#allocation4], 64  }
 0x2f6   :  { %667 = vsyncadd [#allocation4], 4294967232 }
 0x2f7   :  { %413 = vsyncpa [#allocation3], 1 }
 0x2f8   :  { %414 = vsyncpa [#allocation8], 1 }
 0x2f9   :  { %415 = vsyncpa [#allocation11], 1 }
 0x2fa   :  { %416 = vsyncpa [#allocation4], 1 }
 0x2fb   :  { %417 = vsyncpa [#allocation5], 1 }

</bundles_post_ra>
